<compile_context>
chip_gen: v7x
topology: tpu7x:2x2x1
jax: 0.10.0
libtpu: 0.0.40
codegen_flags: <defaults>
</compile_context>

<pallas_src>
import functools

import jax
import jax.numpy as jnp
from jax.experimental import pallas as pl
from jax.experimental.pallas import tpu as pltpu

LANES = 128
SUBLANES = 8


def _tpu_defaults():
    """Return (num_splits, block_rows, vmem_limit_bytes) tuned to the chip.

    Falls back to the conservative, proven configuration when the hardware
    query is unavailable.  num_splits > 1 only when we positively identify a
    multi-TensorCore chip; on single-TC chips the split is a pure serial loop
    and is removed entirely (per perf review).
    """
    num_cores = 1
    vmem_cap = None
    try:
        info = pltpu.get_tpu_info()
        vmem_cap = getattr(info, "vmem_capacity_bytes", None)
        for name in ("num_cores", "core_count", "num_tensorcores",
                     "tensor_core_count", "cores_per_chip"):
            n = getattr(info, name, None)
            if isinstance(n, int) and n in (1, 2):
                num_cores = n
                break
    except Exception:
        pass
    if vmem_cap is None:
        # Unknown chip: proven-safe tile / scoped-VMEM combination.
        return num_cores, 4096, 32 * 1024 * 1024
    if vmem_cap <= 80 * 1024 * 1024:
        # v7x-class (64 MiB VMEM, ~3.2 TB/s per-TC HBM): bigger tiles to
        # amortize the ~0.35 us/grid-step overhead, scope well under 64 MiB.
        return num_cores, 8192, 48 * 1024 * 1024
    # v5e/v6e-class (128 MiB VMEM): plenty of headroom for 8192-row f32 tiles.
    return num_cores, 8192, 64 * 1024 * 1024


def _bce_sum_kernel(logits_ref, target_ref, out_ref, acc_ref, *,
                    pos_weight, rows_valid, block_rows, blocks_per_split,
                    n_blocks, has_phantom, last_block_partial):
    i = pl.program_id(1)                       # row-block within this split

    @pl.when(i == 0)
    def _():
        acc_ref[...] = jnp.zeros_like(acc_ref)

    # Logical global row-block index (split axis is first / core-parallel).
    gb = pl.program_id(0) * blocks_per_split + i

    def accumulate(loss):
        # Pure-VPU accumulate into the (8,128) vector accumulator.
        acc_ref[...] += loss.reshape(block_rows // SUBLANES, SUBLANES,
                                     LANES).sum(axis=0)

    def do_block():
        # In-kernel cast (free VPU work); inputs stream in their source dtype
        # so callers can feed bf16 logits / int8 targets to halve HBM bytes.
        x = logits_ref[...].astype(jnp.float32)
        t = target_ref[...].astype(jnp.float32)
        # Numerically stable BCE-with-logits (same math as sigmoid + logs but
        # never inf/NaN for large |x|):
        #   loss = (1-t)*x + (1 + (pw-1)*t) * (max(-x,0) + log1p(exp(-|x|)))
        softplus_neg = jnp.maximum(-x, 0.0) + jnp.log1p(jnp.exp(-jnp.abs(x)))
        if pos_weight == 1.0:
            loss = (1.0 - t) * x + softplus_neg
        else:
            loss = (1.0 - t) * x + (1.0 + (pos_weight - 1.0) * t) * softplus_neg

        if last_block_partial:
            # Only the last logical block can be row-partial (the wrapper
            # guarantees lane-complete rows), so one sublane-index iota vs. a
            # scalar row count suffices.  Row counts (not flat element
            # indices) keep this int32-safe for huge inputs.
            @pl.when(gb == n_blocks - 1)
            def _():
                row_ids = jax.lax.broadcasted_iota(
                    jnp.int32, (block_rows, LANES), 0)
                valid_rows = rows_valid - gb * block_rows
                accumulate(jnp.where(row_ids < valid_rows, loss, 0.0))

            @pl.when(gb != n_blocks - 1)
            def _():
                accumulate(loss)
        else:
            accumulate(loss)

    if has_phantom:
        # Uneven split: phantom steps skip ALL compute (their DMA re-reads the
        # last real block via the clamped index_map; contribution is zero).
        @pl.when(gb < n_blocks)
        def _():
            do_block()
    else:
        do_block()

    # Lane-dense (8,128) partial sum per split; wrapper does the final reduce.
    @pl.when(i == pl.num_programs(1) - 1)
    def _():
        out_ref[...] = acc_ref[...]


def bce_with_logits(logits, target, pos_weight=1.0, reduction="mean",
                    block_rows=None, num_splits=None):
    assert logits.shape == target.shape
    assert reduction in ("mean", "sum")
    # TODO(synk): per-class tensor pos_weight (PyTorch broadcast) is not
    # supported; only a Python-scalar pos_weight is baked into the kernel.

    auto_splits, auto_block_rows, vmem_limit = _tpu_defaults()
    if num_splits is None:
        num_splits = auto_splits
    if block_rows is None:
        block_rows = auto_block_rows
    assert num_splits >= 1 and block_rows % SUBLANES == 0

    pos_weight = float(pos_weight)
    total = int(logits.size)
    rows_full = total // LANES              # lane-complete rows -> the kernel
    tail = total - rows_full * LANES        # < 128 trailing elements
    n_main = rows_full * LANES

    flat_x = logits.reshape(-1)
    flat_t = target.reshape(-1)

    def stable_loss(x, t):
        x = x.astype(jnp.float32)
        t = t.astype(jnp.float32)
        sp = jnp.maximum(-x, 0.0) + jnp.log1p(jnp.exp(-jnp.abs(x)))
        return (1.0 - t) * x + (1.0 + (pos_weight - 1.0) * t) * sp

    # Unaligned tail handled with a tiny wrapper-side reduction instead of a
    # whole-array jnp.pad copy of both inputs.
    tail_sum = jnp.float32(0.0)
    if tail:
        tail_sum = jnp.sum(stable_loss(flat_x[n_main:], flat_t[n_main:]))

    if rows_full == 0:
        loss_sum = tail_sum
    else:
        if tail:
            x2d = flat_x[:n_main].reshape(rows_full, LANES)
            t2d = flat_t[:n_main].reshape(rows_full, LANES)
        else:
            x2d = flat_x.reshape(rows_full, LANES)
            t2d = flat_t.reshape(rows_full, LANES)

        # Clamp the tile for small inputs; keep it a multiple of 8 sublanes.
        block_rows = min(block_rows, pl.cdiv(rows_full, SUBLANES) * SUBLANES)
        n_blocks = pl.cdiv(rows_full, block_rows)
        blocks_per_split = pl.cdiv(n_blocks, num_splits)
        has_phantom = blocks_per_split * num_splits != n_blocks
        last_block_partial = n_blocks * block_rows != rows_full

        if has_phantom:
            def in_map(s, i):
                # Clamp so a phantom step re-reads the last real block; its
                # contribution is skipped inside the kernel.
                return (jnp.minimum(s * blocks_per_split + i, n_blocks - 1), 0)
        else:
            def in_map(s, i):
                return (s * blocks_per_split + i, 0)

        kernel = functools.partial(
            _bce_sum_kernel,
            pos_weight=pos_weight,
            rows_valid=rows_full,
            block_rows=block_rows,
            blocks_per_split=blocks_per_split,
            n_blocks=n_blocks,
            has_phantom=has_phantom,
            last_block_partial=last_block_partial,
        )

        if num_splits > 1:
            # CORE_PARALLEL actually shards the leading axis across
            # TensorCores (v7x); fall back to "parallel" on older jax.
            core_axis = getattr(pltpu, "CORE_PARALLEL", "parallel")
            arb_axis = getattr(pltpu, "ARBITRARY", "arbitrary")
            dims = (core_axis, arb_axis)
        else:
            dims = ("arbitrary", "arbitrary")

        cost = pl.CostEstimate(
            flops=10 * n_main,
            transcendentals=2 * n_main,
            bytes_accessed=n_main * (x2d.dtype.itemsize + t2d.dtype.itemsize)
            + num_splits * SUBLANES * LANES * 4,
        )

        partials = pl.pallas_call(
            kernel,
            out_shape=jax.ShapeDtypeStruct((num_splits * SUBLANES, LANES),
                                           jnp.float32),
            grid_spec=pltpu.PrefetchScalarGridSpec(
                num_scalar_prefetch=0,
                grid=(num_splits, blocks_per_split),
                in_specs=[
                    pl.BlockSpec((block_rows, LANES), in_map),
                    pl.BlockSpec((block_rows, LANES), in_map),
                ],
                out_specs=pl.BlockSpec((SUBLANES, LANES), lambda s, i: (s, 0)),
                scratch_shapes=[pltpu.VMEM((SUBLANES, LANES), jnp.float32)],
            ),
            compiler_params=pltpu.CompilerParams(
                dimension_semantics=dims,
                vmem_limit_bytes=vmem_limit,
            ),
            cost_estimate=cost,
        )(x2d, t2d)

        loss_sum = jnp.sum(partials) + tail_sum

    if reduction == "mean":
        return loss_sum / jnp.float32(total)
    return loss_sum


def bce_with_logits_ref(logits, target, pos_weight=1.0, reduction="mean"):
    # Literal (naive) module semantics — fine for the small logits used here.
    p = jax.nn.sigmoid(logits.astype(jnp.float32))
    t = target.astype(jnp.float32)
    loss = -pos_weight * t * jnp.log(p) - (1.0 - t) * jnp.log(1.0 - p)
    return loss.mean() if reduction == "mean" else loss.sum()


if __name__ == "__main__":
    key = jax.random.PRNGKey(0)
    k1, k2 = jax.random.split(key)
    # NCHW-shaped inputs, as the PyTorch module would receive.
    shape = (2, 4, 16, 16)
    logits = jax.random.normal(k1, shape, dtype=jnp.float32)
    target = (jax.random.uniform(k2, shape) > 0.5).astype(jnp.float32)

    out = bce_with_logits(logits, target, pos_weight=1.0, reduction="mean")
    out = jax.block_until_ready(out)
    ref = bce_with_logits_ref(logits, target, pos_weight=1.0, reduction="mean")
    assert jnp.allclose(out, ref, rtol=1e-5, atol=1e-5), (out, ref)

    out2 = bce_with_logits(logits, target, pos_weight=2.0, reduction="sum")
    out2 = jax.block_until_ready(out2)
    ref2 = bce_with_logits_ref(logits, target, pos_weight=2.0, reduction="sum")
    assert jnp.allclose(out2, ref2, rtol=1e-5, atol=1e-4), (out2, ref2)

    print("KERNEL_OK")
</pallas_src>

<mosaic_0001>
module attributes {stable_mosaic.version = 11 : i64} {
  func.func @_bce_sum_kernel(%arg0: i32, %arg1: i32, %arg2: memref<16x128xf32, #tpu.memory_space<vmem>>, %arg3: memref<16x128xf32, #tpu.memory_space<vmem>>, %arg4: memref<8x128xf32, #tpu.memory_space<vmem>>, %arg5: memref<8x128xf32, #tpu.memory_space<vmem>>) attributes {dimension_semantics = [#tpu.dimension_semantics<arbitrary>, #tpu.dimension_semantics<arbitrary>], iteration_bounds = array<i64: 1, 1>, scalar_prefetch = 0 : i64, scratch_operands = 1 : i64, tpu.core_type = #tpu.core_type<tc>, window_params = [{transform_indices = @transform_0, window_bounds = array<i64: 16, 128>}, {transform_indices = @transform_1, window_bounds = array<i64: 16, 128>}, {transform_indices = @transform_2, window_bounds = array<i64: 8, 128>}]} {
    %c0_i32 = arith.constant 0 : i32
    %0 = arith.cmpi eq, %arg1, %c0_i32 : i32
    %1 = arith.extui %0 : i1 to i32
    %c0_i32_0 = arith.constant 0 : i32
    %2 = arith.cmpi ne, %1, %c0_i32_0 : i32
    scf.if %2 {
      %cst_14 = arith.constant 0.000000e+00 : f32
      %27 = vector.broadcast %cst_14 : f32 to vector<8x128xf32>
      %c0_15 = arith.constant 0 : index
      %c0_16 = arith.constant 0 : index
      %28 = vector.load %arg5[%c0_15, %c0_16] : memref<8x128xf32, #tpu.memory_space<vmem>>, vector<8x128xf32>
      tpu.vector_store %arg5[%c0_15, %c0_16], %27 {strides = array<i32>} : memref<8x128xf32, #tpu.memory_space<vmem>>, vector<8x128xf32>,
    } else {
    }
    %c0 = arith.constant 0 : index
    %c0_1 = arith.constant 0 : index
    %3 = vector.load %arg2[%c0, %c0_1] : memref<16x128xf32, #tpu.memory_space<vmem>>, vector<16x128xf32>
    %c0_2 = arith.constant 0 : index
    %c0_3 = arith.constant 0 : index
    %4 = vector.load %arg3[%c0_2, %c0_3] : memref<16x128xf32, #tpu.memory_space<vmem>>, vector<16x128xf32>
    %cst = arith.constant 0.000000e+00 : f32
    %5 = vector.broadcast %cst : f32 to vector<16x128xf32>
    %6 = arith.subf %5, %3 : vector<16x128xf32>
    %cst_4 = arith.constant 0.000000e+00 : f32
    %7 = vector.broadcast %cst_4 : f32 to vector<16x128xf32>
    %8 = arith.maximumf %6, %7 : vector<16x128xf32>
    %9 = math.absf %3 : vector<16x128xf32>
    %cst_5 = arith.constant 0.000000e+00 : f32
    %10 = vector.broadcast %cst_5 : f32 to vector<16x128xf32>
    %11 = arith.subf %10, %9 : vector<16x128xf32>
    %12 = math.exp %11 : vector<16x128xf32>
    %13 = math.log1p %12 : vector<16x128xf32>
    %14 = arith.addf %8, %13 : vector<16x128xf32>
    %cst_6 = arith.constant 1.000000e+00 : f32
    %15 = vector.broadcast %cst_6 : f32 to vector<16x128xf32>
    %16 = arith.subf %15, %4 : vector<16x128xf32>
    %17 = arith.mulf %16, %3 : vector<16x128xf32>
    %18 = arith.addf %17, %14 : vector<16x128xf32>
    %c0_7 = arith.constant 0 : index
    %c0_8 = arith.constant 0 : index
    %19 = vector.load %arg5[%c0_7, %c0_8] : memref<8x128xf32, #tpu.memory_space<vmem>>, vector<8x128xf32>
    %20 = vector.shape_cast %18 : vector<16x128xf32> to vector<2x8x128xf32>
    %cst_9 = arith.constant dense<0.000000e+00> : vector<8x128xf32>
    %21 = vector.multi_reduction <add>, %20, %cst_9 [0] : vector<2x8x128xf32> to vector<8x128xf32>
    %22 = arith.addf %19, %21 : vector<8x128xf32>
    %c0_10 = arith.constant 0 : index
    %c0_11 = arith.constant 0 : index
    %23 = vector.load %arg5[%c0_10, %c0_11] : memref<8x128xf32, #tpu.memory_space<vmem>>, vector<8x128xf32>
    tpu.vector_store %arg5[%c0_10, %c0_11], %22 {strides = array<i32>} : memref<8x128xf32, #tpu.memory_space<vmem>>, vector<8x128xf32>,
    %c0_i32_12 = arith.constant 0 : i32
    %24 = arith.cmpi eq, %arg1, %c0_i32_12 : i32
    %25 = arith.extui %24 : i1 to i32
    %c0_i32_13 = arith.constant 0 : i32
    %26 = arith.cmpi ne, %25, %c0_i32_13 : i32
    scf.if %26 {
      %c0_14 = arith.constant 0 : index
      %c0_15 = arith.constant 0 : index
      %27 = vector.load %arg5[%c0_14, %c0_15] : memref<8x128xf32, #tpu.memory_space<vmem>>, vector<8x128xf32>
      %c0_16 = arith.constant 0 : index
      %c0_17 = arith.constant 0 : index
      %28 = vector.load %arg4[%c0_16, %c0_17] : memref<8x128xf32, #tpu.memory_space<vmem>>, vector<8x128xf32>
      tpu.vector_store %arg4[%c0_16, %c0_17], %27 {strides = array<i32>} : memref<8x128xf32, #tpu.memory_space<vmem>>, vector<8x128xf32>,
    } else {
    }
    return
  }
  func.func @transform_0(%arg0: i32, %arg1: i32) -> (i32, i32) {
    %c1_i32 = arith.constant 1 : i32
    %0 = arith.muli %arg0, %c1_i32 : i32
    %1 = arith.addi %0, %arg1 : i32
    %c0_i32 = arith.constant 0 : i32
    %c0_i32_0 = arith.constant 0 : i32
    return %1, %c0_i32 : i32, i32
  }
  func.func @transform_1(%arg0: i32, %arg1: i32) -> (i32, i32) {
    %c1_i32 = arith.constant 1 : i32
    %0 = arith.muli %arg0, %c1_i32 : i32
    %1 = arith.addi %0, %arg1 : i32
    %c0_i32 = arith.constant 0 : i32
    %c0_i32_0 = arith.constant 0 : i32
    return %1, %c0_i32 : i32, i32
  }
  func.func @transform_2(%arg0: i32, %arg1: i32) -> (i32, i32) {
    %c0_i32 = arith.constant 0 : i32
    %c0_i32_0 = arith.constant 0 : i32
    return %arg0, %c0_i32 : i32, i32
  }
}

</mosaic_0001>

<bundles_post_ra>
// kernel: tpu_custom_call.1
= control target key start
LH: loop header
LB: loop body
LE: loop exit
PB: predicated region body
PF: predicated region fallthrough
CT: control target
= control target key end

     0   :  { %7 = vsyncpa [#allocation4], 0  ;;  %s265_s0 = inlined_call_operand.hbm [shape: f32[16,128], index: 0, kind: input, shape index: {}]   ;;  %s266_s1 = inlined_call_operand.hbm [shape: f32[16,128], index: 1, kind: input, shape index: {}]   ;;  %s267_s2 = inlined_call_operand.hbm [shape: f32[8,128], index: 2, kind: output, shape index: {}]  }
   0x1   :  { %8 = vsyncpa [#allocation7], 0 }
   0x2   :  { %9 = vsyncpa [#allocation5], 0  ;;  %s209_s9 = smov [#allocation3]   ;;  %s137_s13 = scalar_lea.hbm %s265_s0, 256 }
   0x3   :  { %s19_s10 = sshll.u32 %s209_s9, 4  ;;  %p138_p0 = scmp.ne.s32.totalorder %s265_s0, %s137_s13  ;;  %s20_s10 = int_to_ptr.vmem [resolvable:$true] %s19_s10 }
   0x4   :  { %p141_p1 = scmp.lt.u32.totalorder %s137_s13, %s265_s0 }
   0x6   :  { %p143_p2 = pnand %p141_p1, %p138_p0 }
   0x8   :  { %146 = shalt.err (!%p143_p2)
}
   0x9   :  { %s147_s18 = scalar_lea.vmem %s20_s10, 256  ;;  %p152_p4 = scmp.lt.s32.totalorder %s20_s10, %s20_s10 }
   0xa   :  { %p148_p3 = scmp.ne.s32.totalorder %s20_s10, %s147_s18  ;;  %p153_p5 = scmp.lt.s32.totalorder %s147_s18, %s147_s18 }
   0xc   :  { %p154_p6 = por %p153_p5, %p152_p4 }
   0xe   :  { %p155_p7 = pnand %p154_p6, %p148_p3 }
  0x10   :  { %158 = shalt.err (!%p155_p7)
}
  0x11   :  { %s210_s19 = smov 128   ;;  %s211_s20 = smov 8  }
  0x12   :  { %25 = dma.hbm_to_vmem [thread:$0]  %s265_s0, 256, %s20_s10, [#allocation4], %s210_s19, %s210_s19, %s211_s20  }
  0x13   :  { %s212_s23 = smov [#allocation6]   ;;  %s159_s27 = scalar_lea.hbm %s266_s1, 256 }
  0x14   :  { %s35_s24 = sshll.u32 %s212_s23, 4  ;;  %p160_p8 = scmp.ne.s32.totalorder %s266_s1, %s159_s27  ;;  %s36_s24 = int_to_ptr.vmem [resolvable:$true] %s35_s24 }
  0x15   :  { %p163_p9 = scmp.lt.u32.totalorder %s159_s27, %s266_s1 }
  0x17   :  { %p165_p10 = pnand %p163_p9, %p160_p8 }
  0x19   :  { %168 = shalt.err (!%p165_p10)
}
  0x1a   :  { %s169_s4 = scalar_lea.vmem %s36_s24, 256  ;;  %p174_p12 = scmp.lt.s32.totalorder %s36_s24, %s36_s24 }
  0x1b   :  { %p170_p11 = scmp.ne.s32.totalorder %s36_s24, %s169_s4  ;;  %p175_p13 = scmp.lt.s32.totalorder %s169_s4, %s169_s4 }
  0x1d   :  { %p176_p0 = por %p175_p13, %p174_p12 }
  0x1f   :  { %p177_p1 = pnand %p176_p0, %p170_p11 }
  0x21   :  { %180 = shalt.err (!%p177_p1)
}
  0x22   :  { %41 = dma.hbm_to_vmem [thread:$0]  %s266_s1, 256, %s36_s24, [#allocation7], %s210_s19, %s210_s19, %s211_s20  }
  0x23   :  { %203 = dma.done.wait [#allocation4], 256  }
  0x24   :  { %204 = vsyncadd [#allocation4], 4294967040 }
  0x25   :  { %205 = dma.done.wait [#allocation7], 256  }
  0x26   :  { %206 = vsyncadd [#allocation7], 4294967040  ;;  %v57_v0 = vld [vmem:[#allocation3] sm:$0xff]  ;;  %v58_v1 = vld [vmem:[#allocation3 + $0x8] sm:$0xff]  ;;  %s213_s1 = smov [#allocation8]  }
  0x27   :  { %v65_v2 = vand.u32 2147483647, %v57_v0  ;;  %v66_v3 = vand.u32 2147483647, %v58_v1  ;;  %v59_v14 = vld [vmem:[#allocation6] sm:$0xff]  ;;  %v60_v16 = vld [vmem:[#allocation6 + $0x8] sm:$0xff] }
  0x28   :  { %v61_v17 = vsub.f32 0.0, %v57_v0  ;;  %v62_v20 = vsub.f32 0.0, %v58_v1  ;;  %v93_v22 = vsub.f32 1.0, %v59_v14  ;;  %v94_v24 = vsub.f32 1.0, %v60_v16  ;;  %s114_s6 = sshll.u32 %s213_s1, 4  ;;  %s115_s6 = int_to_ptr.vmem [resolvable:$true] %s114_s6 }
  0x29   :  { %v67_v4 = vsub.f32 0.0, %v65_v2  ;;  %v68_v5 = vsub.f32 0.0, %v66_v3  ;;  %s181_s7 = scalar_lea.vmem %s115_s6, 128  ;;  %p186_p3 = scmp.lt.s32.totalorder %s115_s6, %s115_s6 }
  0x2a   :  { %v63_v26 = vmax.f32 %v61_v17, 0.0  ;;  %v64_v29 = vmax.f32 %v62_v20, 0.0  ;;  %v95_v32 = vmul.f32 %v93_v22, %v57_v0  ;;  %v96_v34 = vmul.f32 %v94_v24, %v58_v1  ;;  %p182_p2 = scmp.ne.s32.totalorder %s115_s6, %s181_s7  ;;  %p187_p4 = scmp.lt.s32.totalorder %s181_s7, %s181_s7 }
  0x2b   :  { %v69_v6 = vmul.f32 1.442695, %v67_v4  ;;  %v71_v7 = vmul.f32 1.442695, %v68_v5 }
  0x2c   :  { %p188_p5 = por %p187_p4, %p186_p3 }
  0x2d   :  { %129 = vpow2.f32 %v69_v6 }
  0x2e   :  { %131 = vpow2.f32 %v71_v7  ;;  %p189_p6 = pnand %p188_p5, %p182_p2 }
  0x37   :  { %v130_v8 = vpop.eup %129 }
  0x38   :  { %v132_v9 = vpop.eup %131  ;;  %v73_v10 = vadd.f32 1.0, %v130_v8  ;;  %v76_v12 = vmul.f32 -0.5, %v130_v8  ;;  %v79_v18 = vand.u32 2147483647, %v130_v8 }
  0x39   :  { %v82_v11 = vadd.f32 1.0, %v132_v9  ;;  %v85_v13 = vmul.f32 -0.5, %v132_v9  ;;  %v88_v21 = vand.u32 2147483647, %v132_v9 }
  0x3a   :  { %133 = vlog2.f32 %v73_v10  ;;  %v77_v15 = vadd.f32 1.0, %v76_v12  ;;  %vm80_vm0 = vcmp.lt.f32.partialorder %v79_v18, 0.0004427343 }
  0x3b   :  { %135 = vlog2.f32 %v82_v11  ;;  %v86_v19 = vadd.f32 1.0, %v85_v13  ;;  %vm89_vm1 = vcmp.lt.f32.partialorder %v88_v21, 0.0004427343 }
  0x3c   :  { %v78_v23 = vmul.f32 %v130_v8, %v77_v15 }
  0x3d   :  { %v87_v27 = vmul.f32 %v132_v9, %v86_v19 }
  0x44   :  { %v134_v25 = vpop.eup %133 }
  0x45   :  { %v136_v28 = vpop.eup %135  ;;  %v75_v30 = vmul.f32 0.6931472, %v134_v25 }
  0x46   :  { %v84_v31 = vmul.f32 0.6931472, %v136_v28 }
  0x47   :  { %v81_v33 = vsel %vm80_vm0, %v78_v23, %v75_v30 }
  0x48   :  { %v90_v35 = vsel %vm89_vm1, %v87_v27, %v84_v31  ;;  %v91_v36 = vadd.f32 %v81_v33, %v63_v26 }
  0x49   :  { %v92_v37 = vadd.f32 %v90_v35, %v64_v29 }
  0x4a   :  { %v97_v38 = vadd.f32 %v95_v32, %v91_v36 }
  0x4b   :  { %v98_v39 = vadd.f32 %v96_v34, %v92_v37 }
  0x4d   :  { %v100_v40 = vadd.f32 %v98_v39, %v97_v38 }
  0x4f   :  { %107 = vst [vmem:[#allocation8] sm:$0xff] %v100_v40 }
  0x50   :  { %192 = shalt.err (!%p189_p6)
}
  0x51   :  { %s193_s10 = scalar_lea.hbm %s267_s2, 128 }
  0x52   :  { %p194_p7 = scmp.ne.s32.totalorder %s267_s2, %s193_s10  ;;  %p197_p8 = scmp.lt.u32.totalorder %s193_s10, %s267_s2 }
  0x54   :  { %p199_p9 = pnand %p197_p8, %p194_p7 }
  0x56   :  { %202 = shalt.err (!%p199_p9)
}
  0x57   :  { %117 = dma.vmem_to_hbm [thread:$0]  %s115_s6, 128, %s267_s2, [#allocation5]  }
  0x58   :  { %207 = dma.done.wait [#allocation5], 128  }
  0x59   :  { %208 = vsyncadd [#allocation5], 4294967168 }
  0x5a   :  { %121 = vsyncpa [#allocation4], 1 }
  0x5b   :  { %122 = vsyncpa [#allocation7], 1 }
  0x5c   :  { %123 = vsyncpa [#allocation5], 1 }

</bundles_post_ra>
